<compile_context>
chip_gen: v7x
topology: tpu7x:2x2x1
jax: 0.10.0
libtpu: 0.0.40
codegen_flags: <defaults>
</compile_context>

<pallas_src>
import functools

import numpy as np
import jax
import jax.numpy as jnp
from jax.experimental import pallas as pl
from jax.experimental.pallas import tpu as pltpu


# ----------------------------------------------------------------------------
# Host-side construction of the composed pooling matrices (exact small ints).
# ----------------------------------------------------------------------------
def _pool_matrix_np(in_size: int) -> np.ndarray:
    """P[i, r] = 1 iff input row r falls in output row i's 3-wide window.

    Out-of-range rows are simply absent, which together with a constant
    divisor of 9 reproduces AvgPool2d(3, 2, 1) with count_include_pad=True.
    """
    out_size = (in_size - 1) // 2 + 1          # (in + 2*pad - k)//stride + 1
    i = np.arange(out_size)[:, None]
    r = np.arange(in_size)[None, :]
    return (np.abs(r - 2 * i) <= 1).astype(np.float32)


def _composed_pool_matrix(size: int, ratio: int) -> np.ndarray:
    """Compose `ratio` pooling levels -> (final_size, size), small-int entries."""
    mat = np.eye(size, dtype=np.float32)
    cur = size
    for _ in range(ratio):
        p = _pool_matrix_np(cur)
        mat = p @ mat
        cur = p.shape[0]
    return mat


# ----------------------------------------------------------------------------
# Tiling heuristics (VMEM accounting with (sublane, lane) padding).
# ----------------------------------------------------------------------------
# Fixed, generation-safe VMEM budget: below v7x's 64 MiB per-TensorCore VMEM
# (capacity queries may report per-chip numbers on 2-TC chips), leaves Mosaic
# internal-scratch headroom on v5e/v6e (128 MiB), and is far more than needed
# to reach HBM roofline with medium tiles.
_VMEM_LIMIT_BYTES = 48 * 1024 * 1024
_TILE_BUDGET_FRACTION = 0.75


def _ru(x: int, m: int) -> int:
    return ((x + m - 1) // m) * m


def _sublane_pack(dtype) -> int:
    return {4: 8, 2: 16, 1: 32}.get(jnp.dtype(dtype).itemsize, 8)


def _choose_tiles(nc, h, w, ho, wo, in_dtype, work_dtype, out_dtype, budget):
    """Pick (channel block Cb, H slab Th) so padded VMEM use fits the budget."""
    in_sz, wk_sz, out_sz = (jnp.dtype(d).itemsize
                            for d in (in_dtype, work_dtype, out_dtype))
    in_pk, wk_pk, out_pk = (_sublane_pack(d)
                            for d in (in_dtype, work_dtype, out_dtype))
    cast_x = jnp.dtype(in_dtype) != jnp.dtype(work_dtype)

    def footprint(cb, th):
        b = 2 * cb * _ru(th, in_pk) * _ru(w, 128) * in_sz          # x, dbl-buf
        b += 2 * _ru(w, wk_pk) * _ru(wo, 128) * wk_sz              # AwT
        b += 2 * _ru(th, wk_pk) * _ru(ho, 128) * wk_sz             # AhT slab
        b += 2 * cb * _ru(ho, out_pk) * _ru(wo, 128) * out_sz      # out, dbl-buf
        b += _ru(cb * wo, 8) * _ru(ho, 128) * 4                    # f32 accum
        if cast_x:
            b += cb * _ru(th, wk_pk) * _ru(w, 128) * wk_sz         # x cast copy
        b += _ru(cb * th, 8) * _ru(wo, 128) * 4                    # y
        b += 2 * cb * _ru(wo, 8) * _ru(th, 128) * 4                # yT (+relayout)
        b += cb * _ru(wo, wk_pk) * _ru(th, 128) * wk_sz            # yT cast
        b += cb * _ru(ho, 8) * _ru(wo, 128) * 4                    # z at finalize
        return b

    # Keep >= ~8 blocks on the parallel (channel) axis so the BlockSpec
    # pipeline has steps to overlap and both v7x TensorCores get work.
    if nc >= 8:
        cb_cap = -(-nc // 8)
    elif nc >= 2:
        cb_cap = -(-nc // 2)
    else:
        cb_cap = 1

    # Th candidates: whole image first, then multiples of the input sublane
    # pack that divide H exactly (free relayout for the Cb*Th collapse and
    # exact H slabs for the reduction axis).
    ths = [h]
    t = (h // in_pk) * in_pk
    while t >= in_pk:
        if t != h and h % t == 0:
            ths.append(t)
        t -= in_pk

    for th in ths:
        if footprint(1, th) > budget:
            continue
        lo, hi = 1, max(1, cb_cap)
        while lo < hi:                      # largest Cb that still fits
            mid = (lo + hi + 1) // 2
            if footprint(mid, th) <= budget:
                lo = mid
            else:
                hi = mid - 1
        return lo, th

    # Nothing fits even at Cb=1 (extremely wide frames): smallest legal slab,
    # correct but may rely on the compiler's spill handling.
    return 1, ths[-1]


# ----------------------------------------------------------------------------
# Kernel
# ----------------------------------------------------------------------------
def _fused_pool_kernel(x_ref, awt_ref, aht_ref, o_ref, zt_acc, *, scale):
    # x_ref:   (Cb, Th, W)   input slab (original dtype)
    # awt_ref: (W, Wo)       work dtype, exact small integers
    # aht_ref: (Th, Ho)      work dtype, exact small integers (H-slab of AhT)
    # o_ref:   (Cb, Ho, Wo)  output block (constant along the H grid axis)
    # zt_acc:  (Cb*Wo, Ho)   f32 accumulator over H slabs
    j = pl.program_id(1)
    cb, th, w = x_ref.shape
    wo = awt_ref.shape[1]
    ho = aht_ref.shape[1]

    @pl.when(j == 0)
    def _():
        zt_acc[...] = jnp.zeros_like(zt_acc)

    x = x_ref[...]
    if x.dtype != awt_ref.dtype:
        x = x.astype(awt_ref.dtype)

    # ---- pool along W: one large (Cb*Th, W) @ (W, Wo) MXU matmul -----------
    # Th is a multiple of the input sublane pack (or Th == H), so this collapse
    # is a free relayout.
    y = jnp.dot(x.reshape(cb * th, w), awt_ref[...],
                preferred_element_type=jnp.float32)            # (Cb*Th, Wo) f32

    # ---- pool along H: transpose the small intermediate (2^-ratio of the
    # input) on the otherwise-idle XLU, then one large-M 2-D matmul ----------
    yt = jnp.swapaxes(y.reshape(cb, th, wo), 1, 2)             # (Cb, Wo, Th)
    yt = yt.reshape(cb * wo, th).astype(aht_ref.dtype)
    zt_acc[...] += jnp.dot(yt, aht_ref[...],
                           preferred_element_type=jnp.float32)  # (Cb*Wo, Ho)

    @pl.when(j == pl.num_programs(1) - 1)
    def _():
        z = jnp.swapaxes(zt_acc[...].reshape(cb, wo, ho), 1, 2)  # (Cb, Ho, Wo)
        # Epilogue (1/9)^ratio scale on the tiny result: VPU slot is free.
        o_ref[...] = (z * scale).astype(o_ref.dtype)
        # TODO(synk): output lane-width is Wo (<128 for large ratios) -> masked
        # stores; flattening to (NC, Ho*Wo) would densify the writeback, but
        # the output is only 4^-ratio of the input, so it's secondary.


# ----------------------------------------------------------------------------
# Wrapper
# ----------------------------------------------------------------------------
@functools.partial(jax.jit, static_argnames=("ratio",))
def input_injection(x_nchw: jnp.ndarray, ratio: int) -> jnp.ndarray:
    """Equivalent of InputInjection(ratio).forward(x), x in NCHW."""
    if ratio <= 0:
        return x_nchw

    n, c, h, w = x_nchw.shape
    nc = n * c

    ah_np = _composed_pool_matrix(h, ratio)        # (Ho, H), small ints
    aw_np = _composed_pool_matrix(w, ratio)        # (Wo, W), small ints
    ho, wo = ah_np.shape[0], aw_np.shape[0]
    scale = float(np.float64(1.0 / 9.0) ** ratio)

    # Keep low-precision inputs on the full-rate bf16 MXU path as long as the
    # composed integer entries are exactly representable in bf16.
    max_entry = float(max(ah_np.max(), aw_np.max()))
    if x_nchw.dtype == jnp.bfloat16 and max_entry <= 256.0:
        work_dtype = jnp.bfloat16
    else:
        work_dtype = jnp.float32

    awt = jnp.asarray(aw_np.T, dtype=work_dtype)   # (W, Wo)
    aht = jnp.asarray(ah_np.T, dtype=work_dtype)   # (H, Ho)

    budget = int(_VMEM_LIMIT_BYTES * _TILE_BUDGET_FRACTION)
    cb, th = _choose_tiles(nc, h, w, ho, wo, x_nchw.dtype, work_dtype,
                           x_nchw.dtype, budget)
    grid = (pl.cdiv(nc, cb), pl.cdiv(h, th))

    x_flat = x_nchw.reshape(nc, h, w)
    kernel = functools.partial(_fused_pool_kernel, scale=scale)

    out = pl.pallas_call(
        kernel,
        out_shape=jax.ShapeDtypeStruct((nc, ho, wo), x_nchw.dtype),
        grid_spec=pltpu.PrefetchScalarGridSpec(
            num_scalar_prefetch=0,
            grid=grid,
            in_specs=[
                pl.BlockSpec((cb, th, w), lambda i, j: (i, j, 0)),
                pl.BlockSpec((w, wo), lambda i, j: (0, 0)),
                pl.BlockSpec((th, ho), lambda i, j: (j, 0)),
            ],
            out_specs=pl.BlockSpec((cb, ho, wo), lambda i, j: (i, 0, 0)),
            scratch_shapes=[pltpu.VMEM((cb * wo, ho), jnp.float32)],
        ),
        compiler_params=pltpu.CompilerParams(
            dimension_semantics=("parallel", "arbitrary"),
            vmem_limit_bytes=_VMEM_LIMIT_BYTES,
        ),
    )(x_flat, awt, aht)

    return out.reshape(n, c, ho, wo)


# ----------------------------------------------------------------------------
# Pure-JAX reference (level-by-level, like the PyTorch module)
# ----------------------------------------------------------------------------
def _reference_avgpool(x_nchw: jnp.ndarray) -> jnp.ndarray:
    """AvgPool2d(3, 2, 1), count_include_pad=True."""
    N, C, H, W = x_nchw.shape
    Ho = (H - 1) // 2 + 1
    Wo = (W - 1) // 2 + 1
    xp = jnp.pad(x_nchw, ((0, 0), (0, 0), (1, 1), (1, 1)))
    acc = jnp.zeros((N, C, Ho, Wo), jnp.float32)
    for di in range(3):
        for dj in range(3):
            acc = acc + jax.lax.slice(
                xp, (0, 0, di, dj), (N, C, di + 2 * Ho - 1, dj + 2 * Wo - 1),
                (1, 1, 2, 2)).astype(jnp.float32)
    return (acc / 9.0).astype(x_nchw.dtype)


def _reference(x_nchw: jnp.ndarray, ratio: int) -> jnp.ndarray:
    for _ in range(ratio):
        x_nchw = _reference_avgpool(x_nchw)
    return x_nchw


if __name__ == "__main__":
    key = jax.random.PRNGKey(0)
    k0, k1 = jax.random.split(key)

    # Primary check: f32, ratio=2, (2, 4, 16, 16) -> (2, 4, 4, 4)
    x = jax.random.normal(k0, (2, 4, 16, 16), dtype=jnp.float32)
    out = jax.block_until_ready(input_injection(x, ratio=2))
    ref = _reference(x, 2)
    assert out.shape == (2, 4, 4, 4), out.shape
    assert jnp.allclose(out, ref, atol=1e-5, rtol=1e-5), "f32 ratio=2 mismatch"

    # Non-multiple-of-8 spatial dims (exercises the Th == H relayout path).
    x2 = jax.random.normal(k1, (1, 4, 20, 12), dtype=jnp.float32)
    out2 = jax.block_until_ready(input_injection(x2, ratio=1))
    ref2 = _reference(x2, 1)
    assert out2.shape == (1, 4, 10, 6), out2.shape
    assert jnp.allclose(out2, ref2, atol=1e-5, rtol=1e-5), "odd-shape mismatch"

    # bf16 input keeps the bf16 MXU path; scale applied as a VPU epilogue.
    xb = x.astype(jnp.bfloat16)
    outb = jax.block_until_ready(input_injection(xb, ratio=1))
    refb = _reference(xb, 1)
    assert outb.shape == (2, 4, 8, 8), outb.shape
    assert jnp.allclose(outb.astype(jnp.float32), refb.astype(jnp.float32),
                        atol=5e-2, rtol=5e-2), "bf16 mismatch"

    print("KERNEL_OK")
</pallas_src>

<mosaic_0001>
module attributes {stable_mosaic.version = 11 : i64} {
  func.func @_fused_pool_kernel(%arg0: i32, %arg1: i32, %arg2: memref<1x16x16xf32, #tpu.memory_space<vmem>>, %arg3: memref<16x4xf32, #tpu.memory_space<vmem>>, %arg4: memref<16x4xf32, #tpu.memory_space<vmem>>, %arg5: memref<1x4x4xf32, #tpu.memory_space<vmem>>, %arg6: memref<4x4xf32, #tpu.memory_space<vmem>>) attributes {dimension_semantics = [#tpu.dimension_semantics<parallel>, #tpu.dimension_semantics<arbitrary>], iteration_bounds = array<i64: 8, 1>, scalar_prefetch = 0 : i64, scratch_operands = 1 : i64, tpu.core_type = #tpu.core_type<tc>, window_params = [{transform_indices = @transform_0, window_bounds = array<i64: 1, 16, 16>}, {pipeline_mode = #tpu.pipeline_mode<synchronous>, transform_indices = @transform_1, window_bounds = array<i64: 16, 4>}, {transform_indices = @transform_2, window_bounds = array<i64: 16, 4>}, {transform_indices = @transform_3, window_bounds = array<i64: 1, 4, 4>}]} {
    %c0_i32 = arith.constant 0 : i32
    %0 = arith.cmpi eq, %arg1, %c0_i32 : i32
    %1 = arith.extui %0 : i1 to i32
    %c0_i32_0 = arith.constant 0 : i32
    %2 = arith.cmpi ne, %1, %c0_i32_0 : i32
    scf.if %2 {
      %cst_14 = arith.constant 0.000000e+00 : f32
      %18 = vector.broadcast %cst_14 : f32 to vector<4x4xf32>
      %c0_15 = arith.constant 0 : index
      %c0_16 = arith.constant 0 : index
      %19 = vector.load %arg6[%c0_15, %c0_16] : memref<4x4xf32, #tpu.memory_space<vmem>>, vector<4x4xf32>
      tpu.vector_store %arg6[%c0_15, %c0_16], %18 {strides = array<i32>} : memref<4x4xf32, #tpu.memory_space<vmem>>, vector<4x4xf32>,
    } else {
    }
    %c0 = arith.constant 0 : index
    %c0_1 = arith.constant 0 : index
    %c0_2 = arith.constant 0 : index
    %3 = vector.load %arg2[%c0, %c0_1, %c0_2] : memref<1x16x16xf32, #tpu.memory_space<vmem>>, vector<1x16x16xf32>
    %4 = vector.shape_cast %3 : vector<1x16x16xf32> to vector<16x16xf32>
    %c0_3 = arith.constant 0 : index
    %c0_4 = arith.constant 0 : index
    %5 = vector.load %arg3[%c0_3, %c0_4] : memref<16x4xf32, #tpu.memory_space<vmem>>, vector<16x4xf32>
    %cst = arith.constant dense<0.000000e+00> : vector<16x4xf32>
    %6 = tpu.matmul %4, %5, %cst {dimension_numbers = #tpu.dot_dimension_numbers<[1], [0], [0], [1], [0, 0, 1, 1], [], []>} : vector<16x16xf32>, vector<16x4xf32>, vector<16x4xf32> -> vector<16x4xf32>
    %7 = vector.shape_cast %6 : vector<16x4xf32> to vector<1x16x4xf32>
    %8 = tpu.transpose %7, [0, 2, 1] : vector<1x16x4xf32> -> vector<1x4x16xf32>
    %9 = vector.shape_cast %8 : vector<1x4x16xf32> to vector<4x16xf32>
    %c0_5 = arith.constant 0 : index
    %c0_6 = arith.constant 0 : index
    %10 = vector.load %arg6[%c0_5, %c0_6] : memref<4x4xf32, #tpu.memory_space<vmem>>, vector<4x4xf32>
    %c0_7 = arith.constant 0 : index
    %c0_8 = arith.constant 0 : index
    %11 = vector.load %arg4[%c0_7, %c0_8] : memref<16x4xf32, #tpu.memory_space<vmem>>, vector<16x4xf32>
    %cst_9 = arith.constant dense<0.000000e+00> : vector<4x4xf32>
    %12 = tpu.matmul %9, %11, %cst_9 {dimension_numbers = #tpu.dot_dimension_numbers<[1], [0], [0], [1], [0, 0, 1, 1], [], []>} : vector<4x16xf32>, vector<16x4xf32>, vector<4x4xf32> -> vector<4x4xf32>
    %13 = arith.addf %10, %12 : vector<4x4xf32>
    %c0_10 = arith.constant 0 : index
    %c0_11 = arith.constant 0 : index
    %14 = vector.load %arg6[%c0_10, %c0_11] : memref<4x4xf32, #tpu.memory_space<vmem>>, vector<4x4xf32>
    tpu.vector_store %arg6[%c0_10, %c0_11], %13 {strides = array<i32>} : memref<4x4xf32, #tpu.memory_space<vmem>>, vector<4x4xf32>,
    %c0_i32_12 = arith.constant 0 : i32
    %15 = arith.cmpi eq, %arg1, %c0_i32_12 : i32
    %16 = arith.extui %15 : i1 to i32
    %c0_i32_13 = arith.constant 0 : i32
    %17 = arith.cmpi ne, %16, %c0_i32_13 : i32
    scf.if %17 {
      %c0_14 = arith.constant 0 : index
      %c0_15 = arith.constant 0 : index
      %18 = vector.load %arg6[%c0_14, %c0_15] : memref<4x4xf32, #tpu.memory_space<vmem>>, vector<4x4xf32>
      %19 = vector.shape_cast %18 : vector<4x4xf32> to vector<1x4x4xf32>
      %20 = tpu.transpose %19, [0, 2, 1] : vector<1x4x4xf32> -> vector<1x4x4xf32>
      %cst_16 = arith.constant 0.0123456791 : f32
      %21 = vector.broadcast %cst_16 : f32 to vector<1x4x4xf32>
      %22 = arith.mulf %20, %21 : vector<1x4x4xf32>
      %c0_17 = arith.constant 0 : index
      %c0_18 = arith.constant 0 : index
      %c0_19 = arith.constant 0 : index
      %23 = vector.load %arg5[%c0_17, %c0_18, %c0_19] : memref<1x4x4xf32, #tpu.memory_space<vmem>>, vector<1x4x4xf32>
      tpu.vector_store %arg5[%c0_17, %c0_18, %c0_19], %22 {strides = array<i32>} : memref<1x4x4xf32, #tpu.memory_space<vmem>>, vector<1x4x4xf32>,
    } else {
    }
    return
  }
  func.func @transform_0(%arg0: i32, %arg1: i32) -> (i32, i32, i32) {
    %c0_i32 = arith.constant 0 : i32
    %c0_i32_0 = arith.constant 0 : i32
    return %arg0, %arg1, %c0_i32 : i32, i32, i32
  }
  func.func @transform_1(%arg0: i32, %arg1: i32) -> (i32, i32) {
    %c0_i32 = arith.constant 0 : i32
    %c0_i32_0 = arith.constant 0 : i32
    %c0_i32_1 = arith.constant 0 : i32
    return %c0_i32, %c0_i32_0 : i32, i32
  }
  func.func @transform_2(%arg0: i32, %arg1: i32) -> (i32, i32) {
    %c0_i32 = arith.constant 0 : i32
    %c0_i32_0 = arith.constant 0 : i32
    return %arg1, %c0_i32 : i32, i32
  }
  func.func @transform_3(%arg0: i32, %arg1: i32) -> (i32, i32, i32) {
    %c0_i32 = arith.constant 0 : i32
    %c0_i32_0 = arith.constant 0 : i32
    %c0_i32_1 = arith.constant 0 : i32
    return %arg0, %c0_i32, %c0_i32_0 : i32, i32, i32
  }
}

</mosaic_0001>

<bundles_post_ra>
// kernel: input_injection.1
= control target key start
LH: loop header
LB: loop body
LE: loop exit
PB: predicated region body
PF: predicated region fallthrough
CT: control target
= control target key end

     0   :  { %8 = vsyncpa [#allocation4], 0  ;;  %s1202_s0 = inlined_call_operand.hbm [shape: f32[8,16,16], index: 0, kind: input, shape index: {}]   ;;  %s1203_s1 = inlined_call_operand.hbm [shape: f32[16,4], index: 1, kind: input, shape index: {}, may-alias: {1,2}]   ;;  %s1204_s2 = inlined_call_operand.hbm [shape: f32[16,4], index: 2, kind: input, shape index: {}, may-alias: {1,2}]   ;;  %s1205_s3 = inlined_call_operand.hbm [shape: f32[8,4,4], index: 3, kind: output, shape index: {}]  }
   0x1   :  { %10 = vsyncpa [#allocation4 + $0x1], 0 }
   0x2   :  { %11 = vsyncpa [#allocation7], 0 }
   0x3   :  { %12 = vsyncpa [#allocation5], 0 }
   0x4   :  { %14 = vsyncpa [#allocation5 + $0x1], 0  ;;  %s942_s12 = smov 0   ;;  %s944_s13 = smov 0  }
   0x5   :  { %s946_s14 = smov 0   ;;  %s948_s15 = smov 0  }
   0x6   :  { %s950_s16 = smov 0   ;;  %s952_s17 = smov 0  }
   0x7 LB: > { %s601_s18 = sadd.s32 4294967295, %s911_s17   ;;  %s602_s19 = sadd.s32 4294967294, %s911_s17   ;;  %s911_s17 = sphi %s952_s17, %s20_s17   ;;  %s907_s16 = sphi %s950_s16, %s1227_s16   ;;  %s903_s15 = sphi %s948_s15, %s1226_s15   ;;  %s899_s14 = sphi %s946_s14, %s1225_s14   ;;  %s895_s13 = sphi %s944_s13, %s1224_s13   ;;  %s891_s12 = sphi %s942_s12, %s1223_s12  }
   0x8   : > { %p54_p0 = scmp.ne.s32.totalorder %s895_s13, %s891_s12  ;;  %p976_p1 = scmp.eq.s32.totalorder %s601_s18, 0 }
   0x9   : > { %p980_p2 = scmp.eq.s32.totalorder %s601_s18, 7  ;;  %p131_p3 = scmp.eq.s32.totalorder %s602_s19, 7 }
   0xa   : > { %s1210_s20 = scalar_select %p976_p1, 1, 0 }
   0xb   : > { %s1211_s21 = scalar_select %p980_p2, 1, 0 }
   0xc   : > { %p986_p4 = por %p976_p1, %p54_p0  ;;  %p603_p5 = scmp.ge.s32.totalorder %s911_s17, 1 }
   0xd   : > { %p991_p6 = por %p131_p3, %p54_p0  ;;  %p138_p7 = scmp.lt.s32.totalorder %s911_s17, 9 }
   0xe   : > { %s1212_s22 = scalar_select %p986_p4, 1, 0 }
   0xf   : > { %s1213_s23 = scalar_select %p991_p6, 1, 0 }
  0x10   : > { %p996_p8 = pnand %p603_p5, %p138_p7  ;;  %s913_s25 = smov [#allocation6]  }
  0x11   : > { %s150_s26 = sshll.u32 %s913_s25, 4  ;;  %s914_s28 = smov [#allocation8]   ;;  %s151_s26 = int_to_ptr.vmem [resolvable:$true] %s150_s26 }
  0x12   : > { %s1214_s24 = scalar_select %p996_p8, 1, 0 }
  0x13   : > { %p663_p9 = pneg %p996_p8  ;;  %s166_s29 = sshll.u32 %s914_s28, 4  ;;  %s1008_s29 = int_to_ptr.vmem [resolvable:$true] %s166_s29 }
  0x14   : > { %s739_s5 = scalar_lea.hbm %s1203_s1, 256 }
  0x15   : > { %p1004_p10 = pnand %p663_p9, %p976_p1  ;;  %p740_p11 = scmp.ne.s32.totalorder %s1203_s1, %s739_s5 }
  0x16   : > { %p746_p3 = scmp.lt.u32.totalorder %s739_s5, %s1203_s1 }
  0x17   : > { %p741_p12 = pneg %p1004_p10 }
  0x19   : > { %p742_p13 = pnand %p741_p12, %p740_p11 }
  0x1b   : > { %p743_p0 = pneg %p742_p13 }
  0x1d   : > { %p748_p5 = pnand %p746_p3, %p743_p0 }
  0x1f   : > { %751 = shalt.err (!%p748_p5)
}
  0x20   : > { %s752_s10 = scalar_lea.vmem %s151_s26, 256  ;;  %p760_p1 = scmp.lt.s32.totalorder %s151_s26, %s151_s26 }
  0x21   : > { %p753_p7 = scmp.ne.s32.totalorder %s151_s26, %s752_s10  ;;  %p761_p4 = scmp.lt.s32.totalorder %s752_s10, %s752_s10 }
  0x23   : > { %p755_p9 = pnand %p753_p7, %p741_p12  ;;  %p762_p8 = por %p761_p4, %p760_p1 }
  0x25   : > { %p756_p6 = pneg %p755_p9 }
  0x27   : > { %p763_p2 = pnand %p762_p8, %p756_p6 }
  0x29   : > { %766 = shalt.err (!%p763_p2)
}
  0x2a   : > { %s915_s11 = smov 128   ;;  %s916_s18 = smov 8  }
  0x2b   : > { %666 = dma.hbm_to_vmem [thread:$0]  (!%p1004_p10), %s1203_s1, 256, %s151_s26, [#allocation7], %s915_s11, %s915_s11, %s916_s18  }
  0x2c   : > { %s767_s4 = scalar_lea.hbm %s1204_s2, 256 }
  0x2d   : > { %p768_p1 = scmp.ne.s32.totalorder %s1204_s2, %s767_s4  ;;  %p774_p6 = scmp.lt.u32.totalorder %s767_s4, %s1204_s2 }
  0x2f   : > { %p770_p2 = pnand %p768_p1, %p741_p12 }
  0x31   : > { %p771_p4 = pneg %p770_p2 }
  0x33   : > { %p776_p8 = pnand %p774_p6, %p771_p4 }
  0x35   : > { %779 = shalt.err (!%p776_p8)
}
  0x36   : > { %s780_s26 = scalar_lea.vmem %s1008_s29, 256  ;;  %p788_p3 = scmp.lt.s32.totalorder %s1008_s29, %s1008_s29 }
  0x37   : > { %p781_p11 = scmp.ne.s32.totalorder %s1008_s29, %s780_s26  ;;  %p789_p5 = scmp.lt.s32.totalorder %s780_s26, %s780_s26 }
  0x39   : > { %p783_p13 = pnand %p781_p11, %p741_p12  ;;  %p790_p7 = por %p789_p5, %p788_p3 }
  0x3b   : > { %p784_p0 = pneg %p783_p13 }
  0x3d   : > { %p791_p9 = pnand %p790_p7, %p784_p0 }
  0x3f   : > { %794 = shalt.err (!%p791_p9)
}
  0x40   : > { %669 = dma.hbm_to_vmem [thread:$0]  (!%p1004_p10), %s1204_s2, 256, %s1008_s29, [#allocation7], %s915_s11, %s915_s11, %s916_s18  }
  0x41   : > { %s32_s27 = sadd.s32 1, %s907_s16  ;;  %s41_s19 = sadd.s32 1, %s899_s14 }
  0x42   : > { %p34_p12 = scmp.ge.s32.totalorder %s32_s27, 8  ;;  %p48_p1 = scmp.ne.s32.totalorder %s899_s14, %s895_s13 }
  0x43   : > { %p49_p2 = scmp.eq.s32.totalorder %s911_s17, 0  ;;  %p680_p4 = scmp.lt.s32.totalorder %s911_s17, 8 }
  0x44   : > { %s1229_s27 = smov (%p34_p12, %s32_s27), 0  ;;  %p1216_p8 = scmp.ne.s32.totalorder %s1211_s21, 0 }
  0x45   : > { %p50_p6 = por %p49_p2, %p48_p1  ;;  %s36_s28 = ssub.s32 %s907_s16, %s1229_s27 }
  0x46   : > { %p1073_p11 = por %p1216_p8, %p48_p1  ;;  %s180_s30 = sand.u32 1, %s899_s14  }
  0x47   : > { %p39_p13 = scmp.eq.s32.totalorder %s36_s28, 0  ;;  %s607_s29 = sshll.u32 %s180_s30, 4 }
  0x48   : > { %s622_s4 = sshll.u32 %s907_s16, 8  ;;  %s184_s21 = scalar_lea.vmem [#allocation3], %s607_s29 }
  0x49   : > { %s1082_s5 = scalar_select %p39_p13, %s899_s14, %s41_s19  }
  0x4a   : > { %s1087_s8 = scalar_lea.hbm %s1202_s0, %s622_s4  ;;  %s193_s26 = sshll.u32 %s184_s21, 4  ;;  %s1095_s26 = int_to_ptr.vmem [resolvable:$true] %s193_s26 }
  0x4b   : > { %p1091_p10 = pnand %p680_p4, %p50_p6  ;;  %s1097_s10 = scalar_lea.sflag [#allocation4], %s180_s30 }
  0x4c   : > { %s795_s19 = scalar_lea.hbm %s1087_s8, 256  ;;  %s800_s4 = scalar_lea.hbm %s1202_s0, 2048 }
  0x4d   : > { %p796_p0 = scmp.ne.s32.totalorder %s1087_s8, %s795_s19  ;;  %p797_p3 = pneg %p1091_p10 }
  0x4e   : > { %p801_p9 = scmp.lt.u32.totalorder %s1087_s8, %s1202_s0  ;;  %p802_p12 = scmp.lt.u32.totalorder %s800_s4, %s795_s19 }
  0x4f   : > { %p798_p5 = pnand %p797_p3, %p796_p0  ;;  %p804_p2 = scmp.lt.u32.totalorder %s795_s19, %s1087_s8 }
  0x50   : > { %p803_p1 = por %p802_p12, %p801_p9 }
  0x51   : > { %p799_p7 = pneg %p798_p5 }
  0x52   : > { %p805_p4 = por %p804_p2, %p803_p1 }
  0x54   : > { %p806_p6 = pnand %p805_p4, %p799_p7 }
  0x56   : > { %809 = shalt.err (!%p806_p6)
}
  0x57   : > { %s810_s30 = scalar_lea.vmem %s1095_s26, 256  ;;  %s917_s21 = smov [#allocation3]  }
  0x58   : > { %p811_p8 = scmp.ne.s32.totalorder %s1095_s26, %s810_s30  ;;  %s815_s28 = sshll.u32 %s917_s21, 4  ;;  %s816_s28 = int_to_ptr.vmem [resolvable:$false] %s815_s28 }
  0x59   : > { %s817_s29 = scalar_lea.vmem %s816_s28, 512  ;;  %p818_p5 = scmp.lt.s32.totalorder %s1095_s26, %s816_s28 }
  0x5a   : > { %p813_p13 = pnand %p811_p8, %p797_p3  ;;  %p819_p9 = scmp.lt.s32.totalorder %s817_s29, %s810_s30 }
  0x5c   : > { %p814_p0 = pneg %p813_p13  ;;  %p820_p12 = por %p819_p9, %p818_p5 }
  0x5e   : > { %p821_p1 = pnand %p820_p12, %p814_p0 }
  0x60   : > { %824 = shalt.err (!%p821_p1)
}
  0x61   : > { %673 = dma.hbm_to_vmem [thread:$0]  (!%p1091_p10), %s1087_s8, 256, %s1095_s26, %s1097_s10, %s915_s11, %s915_s11, %s916_s18  }
  0x62   : > { %p1219_p3 = scmp.ne.s32.totalorder %s1214_s24, 0 }
  0x63   : > { %s1131_s19 = sand.u32 (!%p1219_p3), 1, %s895_s13   ;;  %p1220_p7 = scmp.ne.s32.totalorder (!%p1219_p3), %s1212_s22, 0 }
  0x64   : > { %205 = sbr.rel (%p1219_p3) target bundleno = 827 (0x33b), region = 32  ;;  %s611_s4 = sshll.u32 (!%p1219_p3), %s1131_s19, 4 }
  0x65   : > { %s208_s6 = scalar_lea.sflag (!%p1219_p3), [#allocation4], %s1131_s19  ;;  %s211_s7 = scalar_lea.vmem (!%p1219_p3), [#allocation3], %s611_s4 }
  0x6b   : > { %878 = dma.done.wait (%p1220_p7), %s208_s6, 256  }
  0x6c   : > { %880 = vsyncadd (%p1220_p7), %s208_s6, 4294967040  ;;  %p1221_p2 = scmp.ne.s32.totalorder %s1210_s20, 0 }
  0x6e   : > { %882 = dma.done.wait (%p1221_p2), [#allocation7], 512  }
  0x6f   : > { %884 = vsyncadd (%p1221_p2), [#allocation7], 4294966784  ;;  %vm254_vm0 = vcmask 130048   ;;  %v252_v0 = vld [vmem:[#allocation6] sm:$0xff]  ;;  %v253_v1 = vld [vmem:[#allocation6 + $0x8] sm:$0xff]  ;;  %vm248_vm1 = vcmask 27648  }
  0x70   : > { %v250_v2 = vld [vmem:[%s211_s7] sm:$0xff]  ;;  %v644_v3 = vpack.c.bf16 %v253_v1, %v252_v0  ;;  %v251_v4 = vld [vmem:[%s211_s7 + $0x8] sm:$0xff]  ;;  %v918_v7 = vmov 0.0|0.0   ;;  %v919_v9 = vmov 0.0   ;;  %vm920_vm2 = vmmov 0   ;;  %s614_s20 = sshll.u32 %s1131_s19, 2 }
  0x71   : > { %634 = vmatprep.mubr.msk.f32.mxu0 %vm254_vm0, %v250_v2  ;;  %v369_v5 = vld [vmem:[#allocation8] sm:$0xff]  ;;  %v370_v6 = vld [vmem:[#allocation8 + $0x8] sm:$0xff]  ;;  %648 = vmatprep.subr.bf16.mxu1 %v918_v7  ;;  %249 = vst.msk [vmem:[#allocation2] sm:$0xf] %vm248_vm1, %v919_v9  ;;  %s619_s22 = sshll.u32 %s903_s15, 6  ;;  %s241_s24 = scalar_lea.vmem [#allocation9], %s614_s20 }
  0x72   : > { %645 = vmatprep.subr.bf16.mxu0 %v644_v3  ;;  %v649_v8 = vpack.c.bf16 %v370_v6, %v369_v5  ;;  %641 = vmatprep.mubr.msk.f32.mxu1 %vm920_vm2, %v919_v9  ;;  %s499_s11 = sshll.u32 %s241_s24, 4  ;;  %s1153_s26 = scalar_lea.hbm %s1205_s3, %s619_s22  ;;  %s1155_s11 = int_to_ptr.vmem [resolvable:$true] %s499_s11 }
  0x73   : > { %647 = vmatpush3.bf16.msra.mxu0 %v644_v3  ;;  %s486_s9 = scalar_lea.sflag [#allocation5], %s1131_s19  ;;  %s825_s10 = scalar_lea.vmem %s1155_s11, 64 }
  0x74   : > { %650 = vmatpush3.bf16.msra.mxu1 %v649_v8  ;;  %p826_p10 = scmp.ne.s32.totalorder %s1155_s11, %s825_s10  ;;  %s921_s15 = smov [#allocation9]  }
  0x75   : > { %s829_s30 = sshll.u32 %s921_s15, 4  ;;  %s830_s30 = int_to_ptr.vmem [resolvable:$false] %s829_s30 }
  0x76   : > { %635 = vmatmul.mubr.msk.f32.vlgmr.msra.gmra.mrb[0].mxu0 %vm254_vm0, %v251_v4  ;;  %p827_p4 = pnand %p826_p10, %p1073_p11  ;;  %s831_s21 = scalar_lea.vmem %s830_s30, 128 }
  0x77   : > { %p832_p8 = scmp.lt.s32.totalorder %s1155_s11, %s830_s30  ;;  %p833_p13 = scmp.lt.s32.totalorder %s831_s21, %s825_s10 }
  0x78   : > { %v368_v13 = vld [vmem:[#allocation2] sm:$0xf]  ;;  %p828_p6 = pneg %p827_p4 }
  0x79   : > { %p834_p0 = por %p833_p13, %p832_p8 }
  0x7b   : > { %p835_p5 = pnand %p834_p0, %p828_p6 }
 0x149   : > { %v636_v10 = vpop.f32.mrb[0].mxu0 }
 0x14a   : > { %v327_v11 = vpop.f32.mrb[1].mxu0 }
 0x14b   : > { %336 = vxpose.xlu0.b32.start [1/2] (short) (narrow) %v327_v11, 8 }
 0x14f   : > { %337 = vxpose.xlu0.b32.end [2/2] (short) (narrow) %v636_v10, 8 }
 0x1cb   : > { %v352_v12 = vpop.trf.xlu0 }
 0x1cc   : > { %642 = vmatmul.mubr.msk.f32.vlgmr.msra.gmra.mrb[0].mxu1 %vm254_vm0, %v352_v12 }
 0x29f   : > { %v440_v14 = vpop.f32.mrb[0].mxu1 }
 0x2a0   : > { %v444_v15 = vadd.f32 %v440_v14, %v368_v13  ;;  %v643_v16 = vpop.f32.mrb[1].mxu1 }
 0x2a2   : > { %446 = vst.msk [vmem:[#allocation2] sm:$0xf] %vm248_vm1, %v444_v15 }
 0x2a9   : > { %v450_v17 = vld [vmem:[#allocation2] sm:$0xf] }
 0x2aa   : > { %451 = vxpose.xlu1.b32.start.end [1/1] (short) (narrow) %v450_v17, 8 }
 0x32a   : > { %v467_v18 = vpop.trf.xlu1 }
 0x32b   : > { %v483_v19 = vmul.f32 0.012345679, %v467_v18 }
 0x32d   : > { %484 = vst.msk [vmem:[%s241_s24] sm:$0xf] %vm248_vm1, %v483_v19 }
 0x32e   : > { %838 = shalt.err (!%p835_p5)
}
 0x32f   : > { %s839_s28 = scalar_lea.hbm %s1153_s26, 64  ;;  %s843_s4 = scalar_lea.hbm %s1205_s3, 512 }
 0x330   : > { %p840_p9 = scmp.ne.s32.totalorder %s1153_s26, %s839_s28  ;;  %p844_p3 = scmp.lt.u32.totalorder %s1153_s26, %s1205_s3 }
 0x331   : > { %p845_p7 = scmp.lt.u32.totalorder %s843_s4, %s839_s28  ;;  %p847_p10 = scmp.lt.u32.totalorder %s839_s28, %s1153_s26 }
 0x332   : > { %p841_p12 = pnand %p840_p9, %p1073_p11 }
 0x333   : > { %p846_p2 = por %p845_p7, %p844_p3 }
 0x334   : > { %p842_p1 = pneg %p841_p12 }
 0x335   : > { %p848_p4 = por %p847_p10, %p846_p2 }
 0x337   : > { %p849_p6 = pnand %p848_p4, %p842_p1 }
 0x339   : > { %852 = shalt.err (!%p849_p6)
}
 0x33a   : > { %661 = dma.vmem_to_hbm [thread:$0]  (%p1073_p11), %s1155_s11, 64, %s1153_s26, %s486_s9  }
 0x33b PF: > { %p683_p8 = scmp.ge.s32.totalorder %s911_s17, 2  ;;  %s511_s20 = sand.u32 1, %s891_s12  }
 0x33c   : > { %p1222_p13 = scmp.ne.s32.totalorder %s1213_s23, 0  ;;  %s512_s22 = scalar_lea.sflag [#allocation5], %s511_s20 }
 0x33e   : > { %p675_p0 = pnand %p683_p8, %p1222_p13 }
 0x340   : > { %886 = dma.done.wait (!%p675_p0), %s512_s22, 64  }
 0x341   : > { %888 = vsyncadd (!%p675_p0), %s512_s22, 4294967232  ;;  %s20_s17 = sadd.s32 1, %s911_s17   ;;  %s1223_s12 = smov %s895_s13 }
 0x342   : > { %p17_p5 = scmp.ge.s32.totalorder %s20_s17, 10   ;;  %s1224_s13 = smov %s899_s14 }
 0x343   : > { %s1225_s14 = smov %s1082_s5  ;;  %s1226_s15 = smov %s907_s16 }
 0x344   : > { %s1227_s16 = smov %s1229_s27  ;;  %19 = sbr.rel (!%p17_p5) target bundleno = 7 (0x7), region = 94 }
 0x34b   :  { %517 = vsyncpa [#allocation4], 1 }
 0x34c   :  { %519 = vsyncpa [#allocation4 + $0x1], 1 }
 0x34d   :  { %520 = vsyncpa [#allocation7], 1 }
 0x34e   :  { %521 = vsyncpa [#allocation5], 1 }
 0x34f   :  { %523 = vsyncpa [#allocation5 + $0x1], 1 }

</bundles_post_ra>
